<compile_context>
chip_gen: v6e
topology: v6e:2x2x1
jax: 0.10.0
libtpu: 0.0.40
codegen_flags: <defaults>
</compile_context>

<pallas_src>
import jax
import jax.numpy as jnp
from jax.experimental import pallas as pl
from jax.experimental.pallas import tpu as pltpu


def linear_kernel(x_ref, w_ref, b_ref, o_ref):
    # x_ref: (B, IN) VMEM, w_ref: (1, IN) VMEM, b_ref: (1, 1) SMEM, o_ref: (B, 1) VMEM
    x = x_ref[...].astype(jnp.float32)          # (B, IN)
    w = w_ref[0, :].astype(jnp.float32)         # (IN,)  -- no transpose / relayout
    b = b_ref[0, 0]                             # scalar from SMEM
    # VPU multiply + cross-lane reduction: (B, IN) -> (B, 1), f32 accumulation.
    y = jnp.sum(x * w, axis=-1, keepdims=True) + b
    o_ref[...] = y.astype(o_ref.dtype)


def my_model_forward(x, weight, bias):
    """Pallas equivalent of MyModel.forward: nn.Linear(10, 1)."""
    B, IN = x.shape
    OUT, IN_w = weight.shape
    assert IN == IN_w
    assert OUT == 1, "MyModel uses nn.Linear(10, 1)"
    bias2d = bias.reshape(1, OUT).astype(jnp.float32)   # (1, 1) scalar for SMEM

    return pl.pallas_call(
        linear_kernel,
        out_shape=jax.ShapeDtypeStruct((B, OUT), x.dtype),
        # No grid: each array is a single whole-array block resident in its
        # memory space, so there is no per-step pipeline machinery at all.
        in_specs=[
            pl.BlockSpec(memory_space=pltpu.MemorySpace.VMEM),   # x
            pl.BlockSpec(memory_space=pltpu.MemorySpace.VMEM),   # weight
            pl.BlockSpec(memory_space=pltpu.MemorySpace.SMEM),   # bias scalar
        ],
        out_specs=pl.BlockSpec(memory_space=pltpu.MemorySpace.VMEM),
    )(x, weight, bias2d)

    # Scalability note (not needed at B=8): for large B, add a 1-D grid over the
    # batch with pl.BlockSpec((tm, IN), lambda i: (i, 0)), tm a multiple of 8
    # (512-1024 rows; size against 64 MiB VMEM on v7x), mark it "parallel" so
    # v7x's two TensorCores split the batch, and keep weight/bias whole-array.


if __name__ == "__main__":
    key = jax.random.PRNGKey(0)
    k_x, k_w, k_b = jax.random.split(key, 3)

    B, IN, OUT = 8, 10, 1

    # Deterministic parameter init mimicking PyTorch's nn.Linear default:
    # U(-1/sqrt(in_features), 1/sqrt(in_features))
    bound = 1.0 / (IN ** 0.5)
    weight = jax.random.uniform(k_w, (OUT, IN), jnp.float32, -bound, bound)
    bias = jax.random.uniform(k_b, (OUT,), jnp.float32, -bound, bound)

    x = jax.random.normal(k_x, (B, IN), jnp.float32)

    out = my_model_forward(x, weight, bias)
    out = jax.block_until_ready(out)

    # Pure-JAX reference check (nn.Linear semantics: y = x @ W.T + b)
    ref = x @ weight.T + bias
    assert out.shape == (B, OUT)
    assert jnp.allclose(out, ref, atol=1e-5, rtol=1e-5)

    print("KERNEL_OK")
</pallas_src>

<mosaic_0001>
module attributes {stable_mosaic.version = 11 : i64} {
  func.func @linear_kernel(%arg0: memref<8x10xf32, #tpu.memory_space<vmem>>, %arg1: memref<1x10xf32, #tpu.memory_space<vmem>>, %arg2: memref<1x1xf32, #tpu.memory_space<smem>>, %arg3: memref<8x1xf32, #tpu.memory_space<vmem>>) attributes {dimension_semantics = [], scalar_prefetch = 0 : i64, scratch_operands = 0 : i64, tpu.core_type = #tpu.core_type<tc>} {
    %c0 = arith.constant 0 : index
    %c0_0 = arith.constant 0 : index
    %0 = vector.load %arg0[%c0, %c0_0] : memref<8x10xf32, #tpu.memory_space<vmem>>, vector<8x10xf32>
    %c0_1 = arith.constant 0 : index
    %c0_2 = arith.constant 0 : index
    %1 = vector.load %arg1[%c0_1, %c0_2] : memref<1x10xf32, #tpu.memory_space<vmem>>, vector<1x10xf32>
    %2 = vector.shape_cast %1 : vector<1x10xf32> to vector<10xf32>
    %c0_3 = arith.constant 0 : index
    %c0_4 = arith.constant 0 : index
    %3 = memref.load %arg2[%c0_3, %c0_4] : memref<1x1xf32, #tpu.memory_space<smem>>
    %4 = vector.shape_cast %2 : vector<10xf32> to vector<1x10xf32>
    %5 = vector.broadcast %4 : vector<1x10xf32> to vector<8x10xf32>
    %6 = arith.mulf %0, %5 : vector<8x10xf32>
    %cst = arith.constant dense<0.000000e+00> : vector<8xf32>
    %7 = vector.multi_reduction <add>, %6, %cst [1] : vector<8x10xf32> to vector<8xf32>
    %8 = vector.shape_cast %7 : vector<8xf32> to vector<8x1xf32>
    %9 = vector.broadcast %3 : f32 to vector<8x1xf32>
    %10 = arith.addf %8, %9 : vector<8x1xf32>
    %c0_5 = arith.constant 0 : index
    %c0_6 = arith.constant 0 : index
    %11 = vector.load %arg3[%c0_5, %c0_6] : memref<8x1xf32, #tpu.memory_space<vmem>>, vector<8x1xf32>
    tpu.vector_store %arg3[%c0_5, %c0_6], %10 {strides = array<i32>} : memref<8x1xf32, #tpu.memory_space<vmem>>, vector<8x1xf32>,
    return
  }
}

</mosaic_0001>

<bundles_post_ra>
// kernel: tpu_custom_call.1
= control target key start
LH: loop header
LB: loop body
LE: loop exit
PB: predicated region body
PF: predicated region fallthrough
CT: control target
= control target key end

     0   :  { %9 = vsyncpa [#allocation4], 0  ;;  %s74_s12 = smov [#allocation3]   ;;  %s107_s0 = inlined_call_operand.hbm [shape: f32[8,10], index: 0, kind: input, shape index: {}]   ;;  %s108_s1 = inlined_call_operand.vmem [shape: f32[1,10], index: 1, kind: input, shape index: {}]   ;;  %s109_s2 = inlined_call_operand.<no memory space> [shape: f32[1,1], index: 2, kind: input, shape index: {}]   ;;  %s110_s3 = inlined_call_operand.vmem [shape: f32[8,1], index: 3, kind: output, shape index: {}]  }
   0x1   :  { %s16_s13 = sshll.u32 %s74_s12, 4  ;;  %s17_s13 = int_to_ptr.vmem [resolvable:$true] %s16_s13 }
   0x2   :  { %s60_s14 = scalar_lea.vmem %s17_s13, 128  ;;  %p65_p1 = scmp.lt.s32.totalorder %s17_s13, %s17_s13 }
   0x3   :  { %p61_p0 = scmp.ne.s32.totalorder %s17_s13, %s60_s14  ;;  %p66_p2 = scmp.lt.s32.totalorder %s60_s14, %s60_s14 }
   0x5   :  { %p67_p3 = por %p66_p2, %p65_p1 }
   0x7   :  { %p68_p4 = pnand %p67_p3, %p61_p0 }
   0x9   :  { %71 = shalt.err (!%p68_p4)
}
   0xa   :  { %19 = dma.hbm_to_vmem [thread:$0]  %s107_s0, 128, %s17_s13, [#allocation4]  }
   0xb   :  { %72 = dma.done.wait [#allocation4], 128  }
   0xc   :  { %73 = vsyncadd [#allocation4], 4294967168  ;;  %v27_v0 = vld [vmem:[#allocation3] sm:$0xff]  ;;  %vm37_vm0 = vcmask 80896   ;;  %v41_v4 = vstv %s109_s2  ;;  %vm43_vm1 = vcmask 7168  }
   0xd   :  { %v50_v1 = vld [vmem:[%s108_s1] ss:$0 sm:$0xff] }
   0xe   :  { %v36_v2 = vmul.f32 %v50_v1, %v27_v0 }
  0x10   :  { %v38_v3 = vsel %vm37_vm0, %v36_v2, 0.0 }
  0x11   :  { %39 = vadd.xlane.f32.xlu0 %v38_v3 }
  0x9a   :  { %v40_v5 = vpop.xlane.xlu0 %39 }
  0x9b   :  { %v42_v6 = vadd.f32 %v41_v4, %v40_v5 }
  0x9d   :  { %44 = vst.msk [vmem:[%s110_s3] sm:$0xff] %vm43_vm1, %v42_v6 }
  0x9e   :  { %49 = vsyncpa [#allocation4], 1 }

</bundles_post_ra>
